<compile_context>
chip_gen: v5e
topology: v5e:2x2
jax: 0.10.0
libtpu: 0.0.40
codegen_flags: <defaults>
</compile_context>

<pallas_src>
import functools
import math

import numpy as np
import jax
import jax.numpy as jnp
from jax import lax
from jax.experimental import pallas as pl
from jax.experimental.pallas import tpu as pltpu


# ---------------------------------------------------------------------------
# Static ring index construction (verbatim translation of Mandala2d.__indices)
# ---------------------------------------------------------------------------
def mandala_indices(size, width, stride):
    c = (size / 2 - 0.5, size / 2 - 0.5)
    md = np.round(np.sqrt(2) * size / 2, 0).astype(int)
    nrings = math.ceil(md / stride)
    rings = [[] for _ in range(nrings)]
    for i in range(size):
        for j in range(size):
            d = math.sqrt((c[0] - i) ** 2 + (c[1] - j) ** 2)
            angle = 180 * math.atan2(j - c[1], i - c[0]) / np.pi + 180
            for k, r in enumerate(range(0, md, stride)):
                if r + width > d >= r:
                    rings[k].append([i, j, d, angle])
    rings = [
        np.array(r)[np.array(r)[:, 3].argsort()][:, :2].astype(int)
        for r in rings
        if len(r) > 0
    ]
    return rings


# ---------------------------------------------------------------------------
# Pallas kernel: one ring per grid step, all batches & channels in the block.
#   lens_ref : (n_rings,) int32 in SMEM (scalar prefetch) -- valid ring length L
#   v_ref    : (B*C, Lpad) f32 -- (batch,channel) on sublanes, ring pos on lanes
#   o_ref    : (B*C, Lpad) f32 -- per batch b: out[:, k] = v[:, (k + a_b) mod L]
#              for k < L, a_b = first argmax of channel 0 of batch b over valid
#              lanes.  Pad lanes (k >= L) are don't-care (host scatters them to
#              a dump slot).
# ---------------------------------------------------------------------------
def ring_roll_kernel(lens_ref, v_ref, o_ref, *, B, C):
    r = pl.program_id(0)
    L = lens_ref[r]                                    # scalar (SMEM)
    vall = v_ref[...]                                  # (B*C, Lpad) f32
    BC, Lpad = vall.shape

    lane = lax.broadcasted_iota(jnp.int32, (BC, Lpad), 1)
    sub = lax.broadcasted_iota(jnp.int32, (BC, Lpad), 0)
    lane_valid = lane < L

    out = jnp.zeros_like(vall)
    for b in range(B):                                 # static unroll, B is small
        # first-occurrence argmax of channel 0 of batch b over valid lanes
        ch0 = jnp.where(lane_valid[0:1, :], vall[b * C:b * C + 1, :], -jnp.inf)
        m = jnp.max(ch0)
        a = jnp.min(
            jnp.where((ch0 == m) & lane_valid[0:1, :], lane[0:1, :], Lpad)
        ).astype(jnp.int32)                            # 0 <= a < L

        # out[k] = v[(k + a) mod L] via two dynamic lane rotations (XLU):
        #   k <  L - a : rotate by (Lpad - a) % Lpad   (== roll by -a)
        #   k >= L - a : rotate by (L - a) % Lpad
        s1 = (Lpad - a) % Lpad
        s2 = (L - a) % Lpad
        r1 = pltpu.roll(vall, s1, axis=1)
        r2 = pltpu.roll(vall, s2, axis=1)
        rb = jnp.where(lane < (L - a), r1, r2)         # exact f32 copy

        in_b = (sub >= b * C) & (sub < (b + 1) * C)    # sublane rows of batch b
        out = jnp.where(in_b, rb, out)

    o_ref[...] = out                                   # full unmasked store


def _mandala_rings_pallas(v, lens, *, B, C, Lpad):
    """v: (B*C, n_rings*Lpad) f32; lens: (n_rings,) int32."""
    BC, total = v.shape
    n_rings = total // Lpad
    kernel = functools.partial(ring_roll_kernel, B=B, C=C)
    grid_spec = pltpu.PrefetchScalarGridSpec(
        num_scalar_prefetch=1,
        grid=(n_rings,),
        in_specs=[pl.BlockSpec((BC, Lpad), lambda r, lens_ref: (0, r))],
        out_specs=pl.BlockSpec((BC, Lpad), lambda r, lens_ref: (0, r)),
    )
    return pl.pallas_call(
        kernel,
        out_shape=jax.ShapeDtypeStruct((BC, total), v.dtype),
        grid_spec=grid_spec,
        compiler_params=pltpu.CompilerParams(
            dimension_semantics=("parallel",)),
    )(lens, v)


# ---------------------------------------------------------------------------
# Forward pass: one gather -> one fused kernel -> one scatter
# ---------------------------------------------------------------------------
def mandala2d_forward(x, rings):
    B, C, H, W = x.shape
    n_rings = len(rings)
    lens_np = np.array([r.shape[0] for r in rings], dtype=np.int32)
    Lmax = int(lens_np.max())
    Lpad = max(128, int(-(-Lmax // 128) * 128))        # lane-dense, mult. of 128

    # Static index tables over the flattened H*W pixel axis.
    #   gather: pad lanes read pixel 0 (masked out by the in-kernel argmax).
    #   scatter: pad lanes write to a dump slot at index H*W (sliced off after).
    gat = np.zeros((n_rings, Lpad), dtype=np.int32)
    sca = np.full((n_rings, Lpad), H * W, dtype=np.int32)
    flat_rings = []
    for k, idx in enumerate(rings):
        L = int(lens_np[k])
        flat = (idx[:, 0] * W + idx[:, 1]).astype(np.int32)
        flat_rings.append(flat)
        gat[k, :L] = flat
        sca[k, :L] = flat

    # Single gather, already in the (B*C, n_rings*Lpad) layout the kernel wants.
    x2 = x.reshape(B * C, H * W)
    v = jnp.take(x2, jnp.asarray(gat.reshape(-1)), axis=1)

    out = _mandala_rings_pallas(v, jnp.asarray(lens_np), B=B, C=C, Lpad=Lpad)

    all_flat = np.concatenate(flat_rings)
    has_overlap = np.unique(all_flat).size != all_flat.size

    if not has_overlap:
        # Single scatter; pad lanes land in the dump slot and are sliced off.
        xm2 = jnp.zeros((B * C, H * W + 1), x.dtype)
        xm2 = xm2.at[:, jnp.asarray(sca.reshape(-1))].set(out)
        xm = xm2[:, :H * W].reshape(B, C, H, W)
    else:
        # Overlapping rings (width > stride): preserve last-ring-wins semantics.
        # TODO(synk): this fallback is per-ring scatters (correct but slower).
        xm2 = jnp.zeros((B * C, H * W), x.dtype)
        for k, flat in enumerate(flat_rings):
            L = int(lens_np[k])
            xm2 = xm2.at[:, jnp.asarray(flat)].set(out[:, k * Lpad:k * Lpad + L])
        xm = xm2.reshape(B, C, H, W)
    return xm


# Pure-JAX reference (for correctness check only)
def mandala2d_reference(x, rings):
    xm = jnp.zeros_like(x)
    for idx in rings:
        rows = jnp.asarray(idx[:, 0])
        cols = jnp.asarray(idx[:, 1])
        v = x[:, :, rows, cols]                        # (B, C, L)
        a = jnp.argmax(v[:, 0, :], axis=-1)            # (B,)
        vi = jax.vmap(lambda vb, ab: jnp.roll(vb, -ab, axis=1))(v, a)
        xm = xm.at[:, :, rows, cols].set(vi)
    return xm


if __name__ == "__main__":
    in_size, width, stride = 16, 2, 2
    B, C = 2, 4
    rings = mandala_indices(in_size, width, stride)

    key = jax.random.PRNGKey(0)
    x = jax.random.normal(key, (B, C, in_size, in_size), dtype=jnp.float32)

    fwd = jax.jit(functools.partial(mandala2d_forward, rings=rings))
    y = fwd(x)
    jax.block_until_ready(y)

    y_ref = mandala2d_reference(x, rings)
    np.testing.assert_allclose(np.asarray(y), np.asarray(y_ref), rtol=1e-6, atol=1e-6)

    print("KERNEL_OK")
</pallas_src>

<mosaic_0001>
module attributes {stable_mosaic.version = 11 : i64} {
  func.func @ring_roll_kernel(%arg0: i32, %arg1: memref<6xi32, #tpu.memory_space<smem>>, %arg2: memref<8x128xf32, #tpu.memory_space<vmem>>, %arg3: memref<8x128xf32, #tpu.memory_space<vmem>>) attributes {dimension_semantics = [#tpu.dimension_semantics<parallel>], iteration_bounds = array<i64: 6>, scalar_prefetch = 1 : i64, scratch_operands = 0 : i64, tpu.core_type = #tpu.core_type<tc>, window_params = [{transform_indices = @transform_0, window_bounds = array<i64: 8, 128>}, {transform_indices = @transform_1, window_bounds = array<i64: 8, 128>}]} {
    %0 = arith.index_cast %arg0 : i32 to index
    %1 = memref.load %arg1[%0] : memref<6xi32, #tpu.memory_space<smem>>
    %c0 = arith.constant 0 : index
    %c0_0 = arith.constant 0 : index
    %2 = vector.load %arg2[%c0, %c0_0] : memref<8x128xf32, #tpu.memory_space<vmem>>, vector<8x128xf32>
    %3 = tpu.iota {dimensions = array<i32: 1>} : vector<8x128xi32>
    %4 = tpu.iota {dimensions = array<i32: 0>} : vector<8x128xi32>
    %5 = vector.broadcast %1 : i32 to vector<8x128xi32>
    %6 = arith.cmpi slt, %3, %5 : vector<8x128xi32>
    %cst = arith.constant 0.000000e+00 : f32
    %7 = vector.broadcast %cst : f32 to vector<8x128xf32>
    %8 = vector.extract_strided_slice %6 {offsets = [0, 0], sizes = [1, 128], strides = [1, 1]} : vector<8x128xi1> to vector<1x128xi1>
    %9 = vector.extract_strided_slice %2 {offsets = [0, 0], sizes = [1, 128], strides = [1, 1]} : vector<8x128xf32> to vector<1x128xf32>
    %cst_1 = arith.constant 0xFF800000 : f32
    %10 = vector.broadcast %cst_1 : f32 to vector<1x128xf32>
    %11 = arith.select %8, %9, %10 : vector<1x128xi1>, vector<1x128xf32>
    %12 = vector.shape_cast %11 : vector<1x128xf32> to vector<1x1x128xf32>
    %cst_2 = arith.constant dense<0xFF800000> : vector<1xf32>
    %13 = vector.multi_reduction <maximumf>, %12, %cst_2 [1, 2] : vector<1x1x128xf32> to vector<1xf32>
    %14 = vector.shape_cast %13 : vector<1xf32> to vector<1x1x1xf32>
    %15 = vector.extract %14[0, 0, 0] : f32 from vector<1x1x1xf32>
    %16 = vector.broadcast %15 : f32 to vector<1x128xf32>
    %17 = arith.cmpf oeq, %11, %16 : vector<1x128xf32>
    %18 = vector.extract_strided_slice %6 {offsets = [0, 0], sizes = [1, 128], strides = [1, 1]} : vector<8x128xi1> to vector<1x128xi1>
    %19 = arith.andi %17, %18 : vector<1x128xi1>
    %20 = vector.extract_strided_slice %3 {offsets = [0, 0], sizes = [1, 128], strides = [1, 1]} : vector<8x128xi32> to vector<1x128xi32>
    %c128_i32 = arith.constant 128 : i32
    %21 = vector.broadcast %c128_i32 : i32 to vector<1x128xi32>
    %22 = arith.select %19, %20, %21 : vector<1x128xi1>, vector<1x128xi32>
    %23 = vector.shape_cast %22 : vector<1x128xi32> to vector<1x1x128xi32>
    %cst_3 = arith.constant dense<2147483647> : vector<1xi32>
    %24 = vector.multi_reduction <minsi>, %23, %cst_3 [1, 2] : vector<1x1x128xi32> to vector<1xi32>
    %25 = vector.shape_cast %24 : vector<1xi32> to vector<1x1x1xi32>
    %26 = vector.extract %25[0, 0, 0] : i32 from vector<1x1x1xi32>
    %c128_i32_4 = arith.constant 128 : i32
    %27 = arith.subi %c128_i32_4, %26 : i32
    %c128_i32_5 = arith.constant 128 : i32
    %c0_i32 = arith.constant 0 : i32
    %28 = arith.cmpi eq, %c128_i32_5, %c0_i32 : i32
    %c1_i32 = arith.constant 1 : i32
    %29 = arith.select %28, %c1_i32, %c128_i32_5 : i32
    %30 = arith.remsi %27, %29 : i32
    %c0_i32_6 = arith.constant 0 : i32
    %31 = arith.cmpi ne, %30, %c0_i32_6 : i32
    %c0_i32_7 = arith.constant 0 : i32
    %32 = arith.cmpi slt, %30, %c0_i32_7 : i32
    %c0_i32_8 = arith.constant 0 : i32
    %33 = arith.cmpi slt, %29, %c0_i32_8 : i32
    %34 = arith.xori %32, %33 : i1
    %35 = arith.andi %34, %31 : i1
    %36 = arith.addi %30, %29 : i32
    %37 = arith.select %35, %36, %30 : i32
    %38 = arith.subi %1, %26 : i32
    %c128_i32_9 = arith.constant 128 : i32
    %c0_i32_10 = arith.constant 0 : i32
    %39 = arith.cmpi eq, %c128_i32_9, %c0_i32_10 : i32
    %c1_i32_11 = arith.constant 1 : i32
    %40 = arith.select %39, %c1_i32_11, %c128_i32_9 : i32
    %41 = arith.remsi %38, %40 : i32
    %c0_i32_12 = arith.constant 0 : i32
    %42 = arith.cmpi ne, %41, %c0_i32_12 : i32
    %c0_i32_13 = arith.constant 0 : i32
    %43 = arith.cmpi slt, %41, %c0_i32_13 : i32
    %c0_i32_14 = arith.constant 0 : i32
    %44 = arith.cmpi slt, %40, %c0_i32_14 : i32
    %45 = arith.xori %43, %44 : i1
    %46 = arith.andi %45, %42 : i1
    %47 = arith.addi %41, %40 : i32
    %48 = arith.select %46, %47, %41 : i32
    %49 = tpu.dynamic_rotate %2 by %37 dim 1 : vector<8x128xf32>, i32 -> vector<8x128xf32>
    %50 = tpu.dynamic_rotate %2 by %48 dim 1 : vector<8x128xf32>, i32 -> vector<8x128xf32>
    %51 = arith.subi %1, %26 : i32
    %52 = vector.broadcast %51 : i32 to vector<8x128xi32>
    %53 = arith.cmpi slt, %3, %52 : vector<8x128xi32>
    %54 = arith.select %53, %49, %50 : vector<8x128xi1>, vector<8x128xf32>
    %c0_i32_15 = arith.constant 0 : i32
    %55 = vector.broadcast %c0_i32_15 : i32 to vector<8x128xi32>
    %56 = arith.cmpi sge, %4, %55 : vector<8x128xi32>
    %c4_i32 = arith.constant 4 : i32
    %57 = vector.broadcast %c4_i32 : i32 to vector<8x128xi32>
    %58 = arith.cmpi slt, %4, %57 : vector<8x128xi32>
    %59 = arith.andi %56, %58 : vector<8x128xi1>
    %60 = arith.select %59, %54, %7 : vector<8x128xi1>, vector<8x128xf32>
    %61 = vector.extract_strided_slice %6 {offsets = [0, 0], sizes = [1, 128], strides = [1, 1]} : vector<8x128xi1> to vector<1x128xi1>
    %62 = vector.extract_strided_slice %2 {offsets = [4, 0], sizes = [1, 128], strides = [1, 1]} : vector<8x128xf32> to vector<1x128xf32>
    %cst_16 = arith.constant 0xFF800000 : f32
    %63 = vector.broadcast %cst_16 : f32 to vector<1x128xf32>
    %64 = arith.select %61, %62, %63 : vector<1x128xi1>, vector<1x128xf32>
    %65 = vector.shape_cast %64 : vector<1x128xf32> to vector<1x1x128xf32>
    %cst_17 = arith.constant dense<0xFF800000> : vector<1xf32>
    %66 = vector.multi_reduction <maximumf>, %65, %cst_17 [1, 2] : vector<1x1x128xf32> to vector<1xf32>
    %67 = vector.shape_cast %66 : vector<1xf32> to vector<1x1x1xf32>
    %68 = vector.extract %67[0, 0, 0] : f32 from vector<1x1x1xf32>
    %69 = vector.broadcast %68 : f32 to vector<1x128xf32>
    %70 = arith.cmpf oeq, %64, %69 : vector<1x128xf32>
    %71 = vector.extract_strided_slice %6 {offsets = [0, 0], sizes = [1, 128], strides = [1, 1]} : vector<8x128xi1> to vector<1x128xi1>
    %72 = arith.andi %70, %71 : vector<1x128xi1>
    %73 = vector.extract_strided_slice %3 {offsets = [0, 0], sizes = [1, 128], strides = [1, 1]} : vector<8x128xi32> to vector<1x128xi32>
    %c128_i32_18 = arith.constant 128 : i32
    %74 = vector.broadcast %c128_i32_18 : i32 to vector<1x128xi32>
    %75 = arith.select %72, %73, %74 : vector<1x128xi1>, vector<1x128xi32>
    %76 = vector.shape_cast %75 : vector<1x128xi32> to vector<1x1x128xi32>
    %cst_19 = arith.constant dense<2147483647> : vector<1xi32>
    %77 = vector.multi_reduction <minsi>, %76, %cst_19 [1, 2] : vector<1x1x128xi32> to vector<1xi32>
    %78 = vector.shape_cast %77 : vector<1xi32> to vector<1x1x1xi32>
    %79 = vector.extract %78[0, 0, 0] : i32 from vector<1x1x1xi32>
    %c128_i32_20 = arith.constant 128 : i32
    %80 = arith.subi %c128_i32_20, %79 : i32
    %c128_i32_21 = arith.constant 128 : i32
    %c0_i32_22 = arith.constant 0 : i32
    %81 = arith.cmpi eq, %c128_i32_21, %c0_i32_22 : i32
    %c1_i32_23 = arith.constant 1 : i32
    %82 = arith.select %81, %c1_i32_23, %c128_i32_21 : i32
    %83 = arith.remsi %80, %82 : i32
    %c0_i32_24 = arith.constant 0 : i32
    %84 = arith.cmpi ne, %83, %c0_i32_24 : i32
    %c0_i32_25 = arith.constant 0 : i32
    %85 = arith.cmpi slt, %83, %c0_i32_25 : i32
    %c0_i32_26 = arith.constant 0 : i32
    %86 = arith.cmpi slt, %82, %c0_i32_26 : i32
    %87 = arith.xori %85, %86 : i1
    %88 = arith.andi %87, %84 : i1
    %89 = arith.addi %83, %82 : i32
    %90 = arith.select %88, %89, %83 : i32
    %91 = arith.subi %1, %79 : i32
    %c128_i32_27 = arith.constant 128 : i32
    %c0_i32_28 = arith.constant 0 : i32
    %92 = arith.cmpi eq, %c128_i32_27, %c0_i32_28 : i32
    %c1_i32_29 = arith.constant 1 : i32
    %93 = arith.select %92, %c1_i32_29, %c128_i32_27 : i32
    %94 = arith.remsi %91, %93 : i32
    %c0_i32_30 = arith.constant 0 : i32
    %95 = arith.cmpi ne, %94, %c0_i32_30 : i32
    %c0_i32_31 = arith.constant 0 : i32
    %96 = arith.cmpi slt, %94, %c0_i32_31 : i32
    %c0_i32_32 = arith.constant 0 : i32
    %97 = arith.cmpi slt, %93, %c0_i32_32 : i32
    %98 = arith.xori %96, %97 : i1
    %99 = arith.andi %98, %95 : i1
    %100 = arith.addi %94, %93 : i32
    %101 = arith.select %99, %100, %94 : i32
    %102 = tpu.dynamic_rotate %2 by %90 dim 1 : vector<8x128xf32>, i32 -> vector<8x128xf32>
    %103 = tpu.dynamic_rotate %2 by %101 dim 1 : vector<8x128xf32>, i32 -> vector<8x128xf32>
    %104 = arith.subi %1, %79 : i32
    %105 = vector.broadcast %104 : i32 to vector<8x128xi32>
    %106 = arith.cmpi slt, %3, %105 : vector<8x128xi32>
    %107 = arith.select %106, %102, %103 : vector<8x128xi1>, vector<8x128xf32>
    %c4_i32_33 = arith.constant 4 : i32
    %108 = vector.broadcast %c4_i32_33 : i32 to vector<8x128xi32>
    %109 = arith.cmpi sge, %4, %108 : vector<8x128xi32>
    %c8_i32 = arith.constant 8 : i32
    %110 = vector.broadcast %c8_i32 : i32 to vector<8x128xi32>
    %111 = arith.cmpi slt, %4, %110 : vector<8x128xi32>
    %112 = arith.andi %109, %111 : vector<8x128xi1>
    %113 = arith.select %112, %107, %60 : vector<8x128xi1>, vector<8x128xf32>
    %c0_34 = arith.constant 0 : index
    %c0_35 = arith.constant 0 : index
    %114 = vector.load %arg3[%c0_34, %c0_35] : memref<8x128xf32, #tpu.memory_space<vmem>>, vector<8x128xf32>
    tpu.vector_store %arg3[%c0_34, %c0_35], %113 {strides = array<i32>} : memref<8x128xf32, #tpu.memory_space<vmem>>, vector<8x128xf32>,
    return
  }
  func.func @transform_0(%arg0: i32, %arg1: memref<6xi32, #tpu.memory_space<smem>>) -> (i32, i32) {
    %c0_i32 = arith.constant 0 : i32
    %c0_i32_0 = arith.constant 0 : i32
    return %c0_i32, %arg0 : i32, i32
  }
  func.func @transform_1(%arg0: i32, %arg1: memref<6xi32, #tpu.memory_space<smem>>) -> (i32, i32) {
    %c0_i32 = arith.constant 0 : i32
    %c0_i32_0 = arith.constant 0 : i32
    return %c0_i32, %arg0 : i32, i32
  }
}

</mosaic_0001>

<bundles_post_ra>
// kernel: mandala2d_forward.1
= control target key start
LH: loop header
LB: loop body
LE: loop exit
PB: predicated region body
PF: predicated region fallthrough
CT: control target
= control target key end

     0   :  { %s406_s12 = smov [#allocation3]   ;;  %s502_s0 = inlined_call_operand.vmem [shape: s32[6], index: 0, kind: input, shape index: {}]   ;;  %s503_s1 = inlined_call_operand.vmem [shape: f32[8,768], index: 1, kind: input, shape index: {}]   ;;  %s504_s2 = inlined_call_operand.vmem [shape: f32[8,768], index: 2, kind: output, shape index: {}]  }
   0x1   :  { %s8_s11 = sshll.u32 %s502_s0, 4  ;;  %s9_s11 = int_to_ptr.vmem [resolvable:$true] %s8_s11 }
   0x2   :  { %11 = dma.vmem_to_smem %s9_s11, 16, %s406_s12, [#allocation2] }
   0x3   :  { %400 = dma.done.wait [#allocation2], 16 }
   0x4   :  { %401 = vsyncadd [#allocation2], 4294967280 }
   0x5   :  { %14 = sfence }
   0x6   :  { %s425_s13 = smov 0  }
   0x7 LB: > { %s346_s14 = sadd.s32 4294967295, %s404_s13   ;;  %p350_p0 = scmp.ge.s32.totalorder %s404_s13, 1  ;;  %s404_s13 = sphi %s425_s13, %s20_s13  }
   0x8   : > { %p95_p1 = scmp.lt.s32.totalorder %s404_s13, 7 }
   0xa   : > { %p96_p2 = pnand %p350_p0, %p95_p1 }
   0xb   : > { %p113_p3 = scmp.lt.s32.totalorder (!%p96_p2), %s346_s14, 5  ;;  %s433_s0 = sld [smem:[#allocation3 + %s346_s14]] (!%p96_p2) }
   0xc   : > { %99 = sbr.rel (%p96_p2) target bundleno = 957 (0x3bd), region = 24 }
  0x11   : > { %v123_v0 = vlaneseq  ;;  %s508_s14 = smov (!%p113_p3, %s346_s14), 5  ;;  %v127_v3 = vstv %s433_s0  ;;  %vm130_vm0 = vcmask 1040384   ;;  %vm211_vm5 = vcmask 1044484  }
  0x12   : > { %s351_s15 = sshll.u32 %s508_s14, 3 }
  0x13   : > { %v438_v1 = vand.u32 127, %v123_v0  ;;  %s116_s18 = scalar_lea.vmem %s503_s1, %s351_s15  ;;  %v126_v63 = vshrl.u32 %v123_v0, 7 }
  0x14   : > { %v446_v2 = vld [vmem:[%s116_s18] sm:$0xff] }
  0x15   : > { %vm450_vm1 = vcmp.lt.s32.totalorder %v438_v1, %v127_v3 }
  0x16   : > { %v457_v5 = vsel %vm450_vm1, %v446_v2, -inf }
  0x17   : > { %v131_v6 = vsel %vm130_vm0, %v457_v5, -inf  ;;  %v212_v23 = vsel %vm211_vm5, %v457_v5, -inf }
  0x18   : > { %132 = vmax.xlane.f32.xlu0 %v131_v6 }
  0x8b   : > { %v133_v7 = vpop.xlane.xlu0 %132 }
  0x8c   : > { %v134_v8 = vrot.slane %v133_v7, 4 }
  0x8e   : > { %v135_v9 = vmax.f32 %v133_v7, %v134_v8 }
  0x90   : > { %v136_v10 = vrot.slane %v135_v9, 2 }
  0x92   : > { %v137_v11 = vmax.f32 %v135_v9, %v136_v10 }
  0x94   : > { %v138_v12 = vrot.slane %v137_v11, 1 }
  0x96   : > { %v139_v13 = vmax.f32 %v137_v11, %v138_v12 }
  0x98   : > { %367 = vpush %v139_v13 }
  0xc9   : > { %s368_s19 = spop %367 }
  0xca   : > { %v141_v14 = vstv %s368_s19 }
  0xcb   : > { %vm142_vm2 = vcmp.eq.f32.partialorder %v457_v5, %v141_v14 }
  0xcc   : > { %vm143_vm3 = vmand %vm142_vm2, %vm450_vm1 }
  0xcd   : > { %v144_v15 = vsel %vm143_vm3, %v438_v1, 128 }
  0xce   : > { %v145_v16 = vsel %vm130_vm0, %v144_v15, 2147483647  ;;  %vm208_vm0 = vcmp.lt.s32.totalorder %v126_v63, 4 }
  0xcf   : > { %v147_v17 = vshra.s32 %v145_v16, 16  ;;  %v146_v19 = vand.u32 65535, %v145_v16 }
  0xd1   : > { %v149_v18 = vcvt.s32.f32 %v147_v17  ;;  %v148_v21 = vcvt.s32.f32 %v146_v19 }
  0xd3   : > { %150 = vmin.xlane.f32.xlu0 %v149_v18 }
 0x146   : > { %v151_v20 = vpop.xlane.xlu0 %150 }
 0x147   : > { %vm152_vm4 = vcmp.eq.f32.partialorder %v149_v18, %v151_v20  ;;  %v157_v24 = vcvt.f32.s32 %v151_v20 }
 0x148   : > { %v153_v22 = vsel %vm152_vm4, %v148_v21, inf }
 0x149   : > { %154 = vmin.xlane.f32.xlu1 %v153_v22  ;;  %v158_v26 = vshll.u32 %v157_v24, 16 }
 0x151   : > { %213 = vmax.xlane.f32.xlu1 %v212_v23 }
 0x1bc   : > { %v155_v25 = vpop.xlane.xlu1 %154 }
 0x1bd   : > { %v156_v27 = vcvt.f32.s32 %v155_v25 }
 0x1bf   : > { %v159_v28 = vadd.s32 %v158_v26, %v156_v27 }
 0x1c1   : > { %v160_v29 = vrot.slane %v159_v28, 4 }
 0x1c3   : > { %vm161_vm6 = vcmp.lt.s32.totalorder %v159_v28, %v160_v29 }
 0x1c4   : > { %v214_v30 = vpop.xlane.xlu1 %213  ;;  %v162_v31 = vsel %vm161_vm6, %v159_v28, %v160_v29 }
 0x1c5   : > { %v215_v32 = vrot.slane %v214_v30, 4  ;;  %v163_v33 = vrot.slane %v162_v31, 2 }
 0x1c7   : > { %v216_v34 = vmax.f32 %v214_v30, %v215_v32  ;;  %vm164_vm7 = vcmp.lt.s32.totalorder %v162_v31, %v163_v33 }
 0x1c8   : > { %v165_v35 = vsel %vm164_vm7, %v162_v31, %v163_v33 }
 0x1c9   : > { %v217_v36 = vrot.slane %v216_v34, 2  ;;  %v166_v37 = vrot.slane %v165_v35, 1 }
 0x1cb   : > { %vm167_vm8 = vcmp.lt.s32.totalorder %v165_v35, %v166_v37  ;;  %v218_v38 = vmax.f32 %v216_v34, %v217_v36 }
 0x1cc   : > { %v168_v39 = vsel %vm167_vm8, %v165_v35, %v166_v37 }
 0x1cd   : > { %369 = vpush %v168_v39  ;;  %v219_v40 = vrot.slane %v218_v38, 1 }
 0x1cf   : > { %v220_v41 = vmax.f32 %v218_v38, %v219_v40 }
 0x1d1   : > { %371 = vpush %v220_v41 }
 0x1fe   : > { %s370_s20 = spop %369 }
 0x1ff   : > { %s170_s21 = ssub.s32 128, %s370_s20  ;;  %s469_s22 = ssub.s32 %s433_s0, %s370_s20 }
 0x200   : > { %p171_p4 = scmp.lt.s32.totalorder %s170_s21, 0  ;;  %s172_s23 = ssub.s32 0, %s170_s21  ;;  %v204_v3 = vstv %s469_s22 }
 0x201   : > { %s353_s24 = smin.u32 %s172_s23, %s170_s21  ;;  %p184_p5 = scmp.lt.s32.totalorder %s469_s22, 0  ;;  %vm205_vm15 = vcmp.lt.s32.totalorder %v438_v1, %v204_v3 }
 0x202   : > { %s174_s25 = sand.u32 127, %s353_s24   ;;  %s185_s26 = ssub.s32 0, %s469_s22 }
 0x203   : > { %s175_s27 = ssub.s32 0, %s174_s25  ;;  %s356_s28 = smin.u32 %s185_s26, %s469_s22 }
 0x204   : > { %s510_s27 = smov (!%p171_p4, %s175_s27), %s174_s25  ;;  %s187_s29 = sand.u32 127, %s356_s28  }
 0x205   : > { %s372_s30 = spop %371  ;;  %s188_s3 = ssub.s32 0, %s187_s29 }
 0x206   : > { %v222_v42 = vstv %s372_s30  ;;  %p355_p6 = scmp.lt.s32.totalorder %s510_s27, 0  ;;  %s512_s3 = smov (!%p184_p5, %s188_s3), %s187_s29 }
 0x207   : > { %vm223_vm9 = vcmp.eq.f32.partialorder %v457_v5, %v222_v42  ;;  %s181_s4 = sadd.s32 128, %s510_s27  ;;  %p358_p7 = scmp.lt.s32.totalorder %s512_s3, 0 }
 0x208   : > { %vm224_vm10 = vmand %vm223_vm9, %vm450_vm1  ;;  %s194_s5 = sadd.s32 128, %s512_s3  ;;  %s514_s4 = smov (!%p355_p6, %s181_s4), %s510_s27  ;;  %vm288_vm1 = vcmp.ge.s32.totalorder %v126_v63, 4 }
 0x209   : > { %v225_v43 = vsel %vm224_vm10, %v438_v1, 128  ;;  %s516_s5 = smov (!%p358_p7, %s194_s5), %s512_s3  ;;  %s196_s6 = sand.u32 127, %s514_s4  }
 0x20a   : > { %v226_v44 = vsel %vm211_vm5, %v225_v43, 2147483647  ;;  %s200_s7 = sand.u32 127, %s516_s5   ;;  %198 = vrot.lane.b32.xlu0 %v446_v2, %s196_s6  ;;  %s120_s28 = scalar_lea.vmem %s504_s2, %s351_s15 }
 0x20b   : > { %v228_v45 = vshra.s32 %v226_v44, 16  ;;  %202 = vrot.lane.b32.xlu1 %v446_v2, %s200_s7  ;;  %v227_v47 = vand.u32 65535, %v226_v44 }
 0x20d   : > { %v230_v46 = vcvt.s32.f32 %v228_v45  ;;  %v229_v49 = vcvt.s32.f32 %v227_v47 }
 0x20f   : > { %231 = vmin.xlane.f32.xlu2 %v230_v46 }
 0x27c   : > { %v199_v62 = vpop.permute.xlu0 %198 }
 0x27d   : > { %v203_v4 = vpop.permute.xlu1 %202 }
 0x27e   : > { %v206_v6 = vsel %vm205_vm15, %v199_v62, %v203_v4 }
 0x27f   : > { %v210_v8 = vsel %vm208_vm0, %v206_v6, 0.0 }
 0x282   : > { %v232_v48 = vpop.xlane.xlu2 %231 }
 0x283   : > { %vm233_vm11 = vcmp.eq.f32.partialorder %v230_v46, %v232_v48  ;;  %v238_v51 = vcvt.f32.s32 %v232_v48 }
 0x284   : > { %v234_v50 = vsel %vm233_vm11, %v229_v49, inf }
 0x285   : > { %235 = vmin.xlane.f32.xlu2 %v234_v50  ;;  %v239_v53 = vshll.u32 %v238_v51, 16 }
 0x2f8   : > { %v236_v52 = vpop.xlane.xlu2 %235 }
 0x2f9   : > { %v237_v54 = vcvt.f32.s32 %v236_v52 }
 0x2fb   : > { %v240_v55 = vadd.s32 %v239_v53, %v237_v54 }
 0x2fd   : > { %v241_v56 = vrot.slane %v240_v55, 4 }
 0x2ff   : > { %vm242_vm12 = vcmp.lt.s32.totalorder %v240_v55, %v241_v56 }
 0x300   : > { %v243_v57 = vsel %vm242_vm12, %v240_v55, %v241_v56 }
 0x301   : > { %v244_v58 = vrot.slane %v243_v57, 2 }
 0x303   : > { %vm245_vm13 = vcmp.lt.s32.totalorder %v243_v57, %v244_v58 }
 0x304   : > { %v246_v59 = vsel %vm245_vm13, %v243_v57, %v244_v58 }
 0x305   : > { %v247_v60 = vrot.slane %v246_v59, 1 }
 0x307   : > { %vm248_vm14 = vcmp.lt.s32.totalorder %v246_v59, %v247_v60 }
 0x308   : > { %v249_v61 = vsel %vm248_vm14, %v246_v59, %v247_v60 }
 0x309   : > { %373 = vpush %v249_v61 }
 0x33a   : > { %s374_s8 = spop %373 }
 0x33b   : > { %s251_s9 = ssub.s32 128, %s374_s8  ;;  %s482_s10 = ssub.s32 %s433_s0, %s374_s8 }
 0x33c   : > { %s253_s11 = ssub.s32 0, %s251_s9  ;;  %p252_p8 = scmp.lt.s32.totalorder %s251_s9, 0  ;;  %v285_v5 = vstv %s482_s10 }
 0x33d   : > { %s359_s12 = smin.u32 %s253_s11, %s251_s9  ;;  %s266_s17 = ssub.s32 0, %s482_s10  ;;  %vm286_vm2 = vcmp.lt.s32.totalorder %v438_v1, %v285_v5 }
 0x33e   : > { %s255_s16 = sand.u32 127, %s359_s12   ;;  %s362_s19 = smin.u32 %s266_s17, %s482_s10 }
 0x33f   : > { %s256_s18 = ssub.s32 0, %s255_s16  ;;  %p265_p9 = scmp.lt.s32.totalorder %s482_s10, 0 }
 0x340   : > { %s518_s18 = smov (!%p252_p8, %s256_s18), %s255_s16  ;;  %s268_s20 = sand.u32 127, %s362_s19  }
 0x341   : > { %s269_s21 = ssub.s32 0, %s268_s20  ;;  %p361_p10 = scmp.lt.s32.totalorder %s518_s18, 0 }
 0x342   : > { %s520_s21 = smov (!%p265_p9, %s269_s21), %s268_s20  ;;  %s262_s0 = sadd.s32 128, %s518_s18 }
 0x343   : > { %p364_p11 = scmp.lt.s32.totalorder %s520_s21, 0  ;;  %s275_s23 = sadd.s32 128, %s520_s21 }
 0x344   : > { %s522_s0 = smov (!%p361_p10, %s262_s0), %s518_s18 }
 0x345   : > { %s524_s23 = smov (!%p364_p11, %s275_s23), %s520_s21  ;;  %s277_s24 = sand.u32 127, %s522_s0  }
 0x346   : > { %s281_s25 = sand.u32 127, %s524_s23   ;;  %279 = vrot.lane.b32.xlu2 %v446_v2, %s277_s24 }
 0x347   : > { %283 = vrot.lane.b32.xlu0 %v446_v2, %s281_s25 }
 0x3a0   : > { %v280_v7 = vpop.permute.xlu2 %279 }
 0x3b9   : > { %v284_v2 = vpop.permute.xlu0 %283 }
 0x3ba   : > { %v287_v9 = vsel %vm286_vm2, %v280_v7, %v284_v2 }
 0x3bb   : > { %v291_v0 = vsel %vm288_vm1, %v287_v9, %v210_v8 }
 0x3bc   : > { %292 = vst [vmem:[%s120_s28] sm:$0xff] %v291_v0 }
 0x3bd PF: > { %s20_s13 = sadd.s32 1, %s404_s13  }
 0x3be   : > { %p17_p12 = scmp.ge.s32.totalorder %s20_s13, 8  }
 0x3c0   :  { %19 = sbr.rel (!%p17_p12) target bundleno = 7 (0x7), region = 54 }

</bundles_post_ra>
